<compile_context>
chip_gen: v7x
topology: tpu7x:2x2x1
jax: 0.10.0
libtpu: 0.0.40
codegen_flags: <defaults>
</compile_context>

<pallas_src>
import functools

import jax
import jax.numpy as jnp
from jax.experimental import pallas as pl
from jax.experimental.pallas import tpu as pltpu


_SMALL_BYPASS_BYTES = 1 * 1024 * 1024   # below this a fused XLA slice*scale wins
_TILE_BYTES_TARGET = 2 * 1024 * 1024    # mem-bound streaming plateaus at ~1-4 MiB tiles


def _round_up(a: int, m: int) -> int:
    return ((a + m - 1) // m) * m


def _vmem_capacity_bytes() -> int:
    try:
        return int(pltpu.get_tpu_info().vmem_capacity_bytes)
    except Exception:
        return 64 * 1024 * 1024  # conservative default (v7x: 64 MiB / TC)


def _scale_kernel(emb_ref, out_ref, *, scale):
    # (tile_r, C) tile: load, scale on the VPU in the output dtype, store.
    # For f32/bf16 tables the astype is a no-op (no f32 upcast of bf16).
    x = emb_ref[...].astype(out_ref.dtype)
    out_ref[...] = x * jnp.asarray(scale, out_ref.dtype)


def _scaled_prefix_rows(table, rows, scale, out_dtype):
    """Returns (rows, C) = table[:rows].astype(out_dtype) * scale, streamed via VMEM.

    Blocks are always (tile_r, C) with tile_r a multiple of the sublane packing
    requirement, so the (8,128)/full-extent rule holds regardless of array
    extents; the ragged final block (input and output) is handled by Pallas
    boundary clipping / masked stores.
    """
    R, C = table.shape
    in_itemsize = jnp.dtype(table.dtype).itemsize
    out_itemsize = jnp.dtype(out_dtype).itemsize
    # Narrower dtype needs the larger sublane multiple (8 f32, 16 bf16, 32 int8).
    min_sub = max(8, 32 // min(in_itemsize, out_itemsize))

    row_bytes = C * max(in_itemsize, out_itemsize)
    rows_cap = max(min_sub, (_TILE_BYTES_TARGET // row_bytes) // min_sub * min_sub)

    # Force >= 2 tiles (even count) so the 'parallel' axis splits across v7x's
    # two TensorCores and the BlockSpec pipeline has something to overlap;
    # tile_r ~= rows / num_tiles keeps the last block from being nearly empty.
    num_tiles = max(2, pl.cdiv(rows, rows_cap))
    if num_tiles % 2:
        num_tiles += 1
    tile_r = _round_up(pl.cdiv(rows, num_tiles), min_sub)
    grid_r = pl.cdiv(rows, tile_r)

    # Double-buffered input + output tiles, plus a little slack.
    step_bytes = 2 * tile_r * C * (in_itemsize + out_itemsize)
    vmem_cap = _vmem_capacity_bytes()
    vmem_limit = min((vmem_cap * 3) // 4,
                     max(16 * 1024 * 1024, step_bytes + 4 * 1024 * 1024))

    cost = pl.CostEstimate(
        flops=rows * C,
        transcendentals=0,
        bytes_accessed=rows * C * (in_itemsize + out_itemsize),
    )

    kernel = functools.partial(_scale_kernel, scale=scale)
    return pl.pallas_call(
        kernel,
        out_shape=jax.ShapeDtypeStruct((rows, C), out_dtype),
        grid_spec=pltpu.PrefetchScalarGridSpec(
            num_scalar_prefetch=0,
            grid=(grid_r,),
            in_specs=[pl.BlockSpec((tile_r, C), lambda i: (i, 0))],
            out_specs=pl.BlockSpec((tile_r, C), lambda i: (i, 0)),
        ),
        compiler_params=pltpu.CompilerParams(
            dimension_semantics=("parallel",),
            vmem_limit_bytes=int(vmem_limit),
        ),
        cost_estimate=cost,
    )(table)


def absolute_positional_embedding(x, emb_table, *, force_kernel=False):
    """emb_table[:x.shape[1]] * dim**-0.5, shaped (1, n, dim)."""
    n = x.shape[1]
    max_seq_len, dim = emb_table.shape
    assert n <= max_seq_len, "sequence length exceeds max_seq_len"
    scale = float(dim) ** (-0.5)
    in_dtype = emb_table.dtype
    # Low-precision / integer tables would truncate to ~0 after scaling; emit float.
    out_dtype = in_dtype if jnp.issubdtype(in_dtype, jnp.floating) else jnp.float32
    itemsize = jnp.dtype(in_dtype).itemsize

    if not force_kernel and n * dim * itemsize < _SMALL_BYPASS_BYTES:
        # Tiny shapes: kernel launch + DMA setup dwarfs the copy; let XLA fuse
        # the slice+scale into the consumer.  Same dtype math as the kernel.
        pos = emb_table[:n].astype(out_dtype)
        return (pos * jnp.asarray(scale, out_dtype))[None]

    if dim % 128 != 0 and (max_seq_len * dim) % 128 == 0:
        # Lane-dense relayout: the prefix is contiguous and the scale uniform,
        # so the first n rows are just the first n*dim elements.  Reshape is
        # free in HBM (row-major); keeps output stores unmasked for dim < 128.
        table = emb_table.reshape(max_seq_len * dim // 128, 128)
        rows_flat = pl.cdiv(n * dim, 128)
        out = _scaled_prefix_rows(table, rows_flat, scale, out_dtype)
        flat = out.reshape(-1)
        if rows_flat * 128 != n * dim:
            flat = flat[: n * dim]   # rare unaligned tail (< 128 elements)
        return flat.reshape(n, dim)[None]

    out = _scaled_prefix_rows(emb_table, n, scale, out_dtype)
    return out[None]


if __name__ == "__main__":
    key = jax.random.PRNGKey(0)
    k1, k2, k3, k4, kx = jax.random.split(key, 5)

    # --- Test 1: module-sized config (dim=32, max_seq_len=16, batch=2, seq=8) ---
    dim, max_seq_len, batch, seq = 32, 16, 2, 8
    emb = jax.random.normal(k1, (max_seq_len, dim), dtype=jnp.float32)
    x = jax.random.randint(kx, (batch, seq), 0, max_seq_len)
    ref = (emb[:seq] * (dim ** -0.5))[None]

    out_k = jax.block_until_ready(
        absolute_positional_embedding(x, emb, force_kernel=True))
    assert out_k.shape == (1, seq, dim)
    assert jnp.allclose(out_k, ref, atol=1e-6, rtol=1e-6), "kernel path mismatch"

    out_f = jax.block_until_ready(absolute_positional_embedding(x, emb))
    assert jnp.allclose(out_f, ref, atol=1e-6, rtol=1e-6), "bypass path mismatch"

    # --- Test 2: lane-aligned table (dim multiple of 128) -> tiled streaming ---
    dim2, msl2, seq2 = 512, 4096, 3000
    emb2 = jax.random.normal(k2, (msl2, dim2), dtype=jnp.float32)
    x2 = jnp.zeros((1, seq2), dtype=jnp.int32)
    out2 = jax.block_until_ready(absolute_positional_embedding(x2, emb2))
    ref2 = (emb2[:seq2] * (dim2 ** -0.5))[None]
    assert out2.shape == (1, seq2, dim2)
    assert jnp.allclose(out2, ref2, atol=1e-6, rtol=1e-6), "tiled path mismatch"

    # --- Test 3: dim < 128 at scale -> lane-dense flattened path ---
    dim3, msl3, seq3 = 64, 8192, 3000
    emb3 = jax.random.normal(k3, (msl3, dim3), dtype=jnp.float32)
    x3 = jnp.zeros((1, seq3), dtype=jnp.int32)
    out3 = jax.block_until_ready(absolute_positional_embedding(x3, emb3))
    ref3 = (emb3[:seq3] * (dim3 ** -0.5))[None]
    assert out3.shape == (1, seq3, dim3)
    assert jnp.allclose(out3, ref3, atol=1e-6, rtol=1e-6), "flattened path mismatch"

    # --- Test 4: bf16 table -> native-dtype multiply (no f32 upcast) ---
    dim4, msl4, seq4 = 256, 2048, 1000
    emb4 = jax.random.normal(k4, (msl4, dim4), dtype=jnp.bfloat16)
    x4 = jnp.zeros((1, seq4), dtype=jnp.int32)
    out4 = jax.block_until_ready(
        absolute_positional_embedding(x4, emb4, force_kernel=True))
    ref4 = (emb4[:seq4] * jnp.asarray(dim4 ** -0.5, jnp.bfloat16))[None]
    assert out4.shape == (1, seq4, dim4) and out4.dtype == jnp.bfloat16
    assert jnp.allclose(out4.astype(jnp.float32), ref4.astype(jnp.float32),
                        atol=1e-2, rtol=1e-2), "bf16 path mismatch"

    print("KERNEL_OK")
</pallas_src>

<mosaic_0001>
module attributes {stable_mosaic.version = 11 : i64} {
  func.func @_scale_kernel(%arg0: i32, %arg1: memref<8x128xf32, #tpu.memory_space<vmem>>, %arg2: memref<8x128xf32, #tpu.memory_space<vmem>>) attributes {dimension_semantics = [#tpu.dimension_semantics<parallel>], iteration_bounds = array<i64: 1>, scalar_prefetch = 0 : i64, scratch_operands = 0 : i64, tpu.core_type = #tpu.core_type<tc>, window_params = [{transform_indices = @transform_0, window_bounds = array<i64: 8, 128>}, {transform_indices = @transform_1, window_bounds = array<i64: 8, 128>}]} {
    %c0 = arith.constant 0 : index
    %c0_0 = arith.constant 0 : index
    %0 = vector.load %arg1[%c0, %c0_0] : memref<8x128xf32, #tpu.memory_space<vmem>>, vector<8x128xf32>
    %cst = arith.constant 0.176776692 : f32
    %1 = vector.broadcast %cst : f32 to vector<8x128xf32>
    %2 = arith.mulf %0, %1 : vector<8x128xf32>
    %c0_1 = arith.constant 0 : index
    %c0_2 = arith.constant 0 : index
    %3 = vector.load %arg2[%c0_1, %c0_2] : memref<8x128xf32, #tpu.memory_space<vmem>>, vector<8x128xf32>
    tpu.vector_store %arg2[%c0_1, %c0_2], %2 {strides = array<i32>} : memref<8x128xf32, #tpu.memory_space<vmem>>, vector<8x128xf32>,
    return
  }
  func.func @transform_0(%arg0: i32) -> (i32, i32) {
    %c0_i32 = arith.constant 0 : i32
    %c0_i32_0 = arith.constant 0 : i32
    return %arg0, %c0_i32 : i32, i32
  }
  func.func @transform_1(%arg0: i32) -> (i32, i32) {
    %c0_i32 = arith.constant 0 : i32
    %c0_i32_0 = arith.constant 0 : i32
    return %arg0, %c0_i32 : i32, i32
  }
}

</mosaic_0001>

<bundles_post_ra>
// kernel: tpu_custom_call.1
= control target key start
LH: loop header
LB: loop body
LE: loop exit
PB: predicated region body
PF: predicated region fallthrough
CT: control target
= control target key end

     0   :  { %6 = vsyncpa [#allocation3], 0  ;;  %s137_s0 = inlined_call_operand.hbm [shape: f32[4,128], index: 0, kind: input, shape index: {}]   ;;  %s138_s1 = inlined_call_operand.hbm [shape: f32[2,128], index: 1, kind: output, shape index: {}]  }
   0x1   :  { %7 = vsyncpa [#allocation4], 0 }
   0x2   :  { %12 = vsyncadd [#allocation3], 64  ;;  %s97_s6 = smov [#allocation2]   ;;  %s49_s10 = scalar_lea.hbm %s137_s0, 64 }
   0x3   :  { %s13_s7 = sshll.u32 %s97_s6, 4  ;;  %p50_p0 = scmp.ne.s32.totalorder %s137_s0, %s49_s10  ;;  %s14_s7 = int_to_ptr.vmem [resolvable:$true] %s13_s7 }
   0x4   :  { %p53_p1 = scmp.lt.u32.totalorder %s49_s10, %s137_s0 }
   0x6   :  { %p55_p2 = pnand %p53_p1, %p50_p0 }
   0x8   :  { %58 = shalt.err (!%p55_p2)
}
   0x9   :  { %s59_s15 = scalar_lea.vmem %s14_s7, 64  ;;  %s63_s16 = scalar_lea.vmem %s14_s7, 128 }
   0xa   :  { %p60_p3 = scmp.ne.s32.totalorder %s14_s7, %s59_s15  ;;  %p64_p4 = scmp.lt.s32.totalorder %s14_s7, %s14_s7 }
   0xb   :  { %p65_p5 = scmp.lt.s32.totalorder %s63_s16, %s59_s15 }
   0xd   :  { %p66_p6 = por %p65_p5, %p64_p4 }
   0xf   :  { %p67_p7 = pnand %p66_p6, %p60_p3 }
  0x11   :  { %70 = shalt.err (!%p67_p7)
}
  0x12   :  { %s98_s17 = smov 64   ;;  %s99_s18 = smov 4  }
  0x13   :  { %19 = dma.hbm_to_vmem [thread:$0]  %s137_s0, 64, %s14_s7, [#allocation3], %s98_s17, %s98_s17, %s99_s18  }
  0x14   :  { %93 = dma.done.wait [#allocation3], 128  }
  0x15   :  { %94 = vsyncadd [#allocation3], 4294967168  ;;  %v23_v0 = vld [vmem:[#allocation2] sm:$0xff] }
  0x16   :  { %v24_v1 = vmul.f32 0.17677669, %v23_v0 }
  0x18   :  { %25 = vst [vmem:[#allocation5] sm:$0xff] %v24_v1 }
  0x19   :  { %30 = vsyncadd [#allocation4], 96  ;;  %s100_s21 = smov [#allocation5]  }
  0x1a   :  { %s31_s22 = sshll.u32 %s100_s21, 4  ;;  %s32_s22 = int_to_ptr.vmem [resolvable:$true] %s31_s22 }
  0x1b   :  { %s71_s23 = scalar_lea.vmem %s32_s22, 32  ;;  %s75_s24 = scalar_lea.vmem %s32_s22, 128 }
  0x1c   :  { %p72_p8 = scmp.ne.s32.totalorder %s32_s22, %s71_s23  ;;  %p76_p9 = scmp.lt.s32.totalorder %s32_s22, %s32_s22 }
  0x1d   :  { %p77_p10 = scmp.lt.s32.totalorder %s75_s24, %s71_s23 }
  0x1f   :  { %p78_p11 = por %p77_p10, %p76_p9 }
  0x21   :  { %p79_p12 = pnand %p78_p11, %p72_p8 }
  0x23   :  { %82 = shalt.err (!%p79_p12)
}
  0x24   :  { %s83_s0 = scalar_lea.hbm %s138_s1, 32 }
  0x25   :  { %p84_p13 = scmp.ne.s32.totalorder %s138_s1, %s83_s0  ;;  %p87_p0 = scmp.lt.u32.totalorder %s83_s0, %s138_s1 }
  0x27   :  { %p89_p1 = pnand %p87_p0, %p84_p13 }
  0x29   :  { %92 = shalt.err (!%p89_p1)
}
  0x2a   :  { %s101_s2 = smov 32   ;;  %s102_s3 = smov 2  }
  0x2b   :  { %37 = dma.vmem_to_hbm [thread:$0]  %s32_s22, 32, %s138_s1, [#allocation4], %s101_s2, %s101_s2, %s102_s3  }
  0x2c   :  { %95 = dma.done.wait [#allocation4], 128  }
  0x2d   :  { %96 = vsyncadd [#allocation4], 4294967168 }
  0x2e   :  { %41 = vsyncpa [#allocation3], 1 }
  0x2f   :  { %42 = vsyncpa [#allocation4], 1 }

</bundles_post_ra>
